<compile_context>
chip_gen: v6e
topology: v6e:2x2x1
jax: 0.10.0
libtpu: 0.0.40
codegen_flags: <defaults>
</compile_context>

<pallas_src>
import jax
import jax.numpy as jnp
from jax.experimental import pallas as pl
from jax.experimental.pallas import tpu as pltpu

_LANE = 128          # vreg lane width
_SUBLANE_ALIGN = 16  # bf16 sublane packing (2 rows / sublane)


def _cdiv(a, b):
    return -(-a // b)


def _round_up(x, m):
    return ((x + m - 1) // m) * m


def _mlp_kernel(x_ref,
                w1_ref, b1_ref,
                w2_ref, b2_ref,
                w3_ref, b3_ref,
                w4_ref, b4_ref,
                o_ref):
    """Fused 4-layer MLP: bf16 MXU matmuls, f32 accumulation, f32 VPU epilogue."""
    # Layer 1: Linear(S, 256) + ReLU    (Dropout(0.2) == identity in eval)
    h = jnp.dot(x_ref[...], w1_ref[...],
                preferred_element_type=jnp.float32) + b1_ref[...]
    h = jnp.maximum(h, 0.0)

    # Layer 2: Linear(256, 128) + ReLU  (Dropout(0.2) == identity in eval)
    h = jnp.dot(h.astype(jnp.bfloat16), w2_ref[...],
                preferred_element_type=jnp.float32) + b2_ref[...]
    h = jnp.maximum(h, 0.0)

    # Layer 3: Linear(128, 64 -> padded 128) + ReLU (padded lanes stay exactly 0)
    h = jnp.dot(h.astype(jnp.bfloat16), w3_ref[...],
                preferred_element_type=jnp.float32) + b3_ref[...]
    h = jnp.maximum(h, 0.0)

    # Layer 4: Linear(64 -> padded 128, A -> padded 128); store only the real A
    # output lanes so the HBM writeback is (tile, A) instead of (tile, 128).
    o = jnp.dot(h.astype(jnp.bfloat16), w4_ref[...],
                preferred_element_type=jnp.float32) + b4_ref[...]
    o_ref[...] = o[:, :o_ref.shape[1]]


def prepare_params(params):
    """One-time parameter prep (hoisted out of the per-call path).

    Casts weights to bf16 for the MXU, keeps biases in f32, and zero-pads the
    last two layers to 128 lanes so the hidden activations stay lane-dense.
    Returns (prepared_dict, action_size).
    """
    d2 = params["w3"].shape[0]            # 128
    h3 = params["w3"].shape[1]            # 64
    A = params["w4"].shape[1]
    h3_pad = _round_up(h3, _LANE)         # 128
    a_pad = _round_up(A, _LANE)           # 128

    w3 = jnp.zeros((d2, h3_pad), jnp.bfloat16).at[:, :h3].set(
        params["w3"].astype(jnp.bfloat16))
    w4 = jnp.zeros((h3_pad, a_pad), jnp.bfloat16).at[:h3, :A].set(
        params["w4"].astype(jnp.bfloat16))
    b3 = jnp.zeros((1, h3_pad), jnp.float32).at[:, :h3].set(
        params["b3"].astype(jnp.float32))
    b4 = jnp.zeros((1, a_pad), jnp.float32).at[:, :A].set(
        params["b4"].astype(jnp.float32))

    prepared = {
        "w1": params["w1"].astype(jnp.bfloat16),
        "b1": params["b1"].astype(jnp.float32),
        "w2": params["w2"].astype(jnp.bfloat16),
        "b2": params["b2"].astype(jnp.float32),
        "w3": w3, "b3": b3,
        "w4": w4, "b4": b4,
    }
    return prepared, A


def _choose_tiling(B, batch_tile):
    """Pick grid-step count first, then tile size, minimizing dead padded rows."""
    min_steps = 2 if B >= 256 else 1          # keep both v7x TensorCores busy
    n_steps = max(_cdiv(B, batch_tile), min_steps)
    tile = _cdiv(B, n_steps)
    # Full MXU-M passes for big tiles; minimal (bf16-packing-aligned) padding otherwise.
    align = 128 if tile >= 512 else _SUBLANE_ALIGN
    tile = _round_up(tile, align)
    n_steps = _cdiv(B, tile)
    return tile, n_steps * tile, n_steps


def player_behavior_forward(x, prepared, action_size, *, batch_tile=1024):
    """Run the fused MLP Pallas kernel.

    x:           (B, state_size) float32 (cast to bf16 for the HBM->VMEM stream)
    prepared:    output of prepare_params() (bf16 weights, padded layers 3/4)
    action_size: number of real output columns A
    batch_tile:  target rows per grid step (actual tile is derived from B).
    """
    B, S = x.shape
    A = action_size
    w1, b1 = prepared["w1"], prepared["b1"]
    w2, b2 = prepared["w2"], prepared["b2"]
    w3, b3 = prepared["w3"], prepared["b3"]
    w4, b4 = prepared["w4"], prepared["b4"]
    d1, d2 = w1.shape[1], w2.shape[1]
    h3_pad, a_pad = w3.shape[1], w4.shape[1]

    tile, b_pad, n_steps = _choose_tiling(B, batch_tile)

    # bf16 activations: halves the input HBM stream; MXU consumes bf16 either way.
    x_pad = x.astype(jnp.bfloat16)
    if b_pad != B:
        x_pad = jnp.pad(x_pad, ((0, b_pad - B), (0, 0)))

    flops = int(2 * b_pad * (S * d1 + d1 * d2 + d2 * h3_pad + h3_pad * a_pad))
    bytes_accessed = int(
        b_pad * S * 2 + b_pad * A * 4
        + sum(int(w.size) * 2 for w in (w1, w2, w3, w4))
        + sum(int(b.size) * 4 for b in (b1, b2, b3, b4)))
    cost = pl.CostEstimate(flops=flops, transcendentals=0,
                           bytes_accessed=bytes_accessed)

    def const_spec(shape):
        # Grid-invariant operand: block index never changes, so Pallas only DMAs it once.
        return pl.BlockSpec(shape, lambda i: tuple(0 for _ in shape))

    out = pl.pallas_call(
        _mlp_kernel,
        out_shape=jax.ShapeDtypeStruct((b_pad, A), jnp.float32),
        grid_spec=pltpu.PrefetchScalarGridSpec(
            num_scalar_prefetch=0,
            grid=(n_steps,),
            in_specs=[
                pl.BlockSpec((tile, S), lambda i: (i, 0)),
                const_spec(w1.shape), const_spec(b1.shape),
                const_spec(w2.shape), const_spec(b2.shape),
                const_spec(w3.shape), const_spec(b3.shape),
                const_spec(w4.shape), const_spec(b4.shape),
            ],
            out_specs=pl.BlockSpec((tile, A), lambda i: (i, 0)),
        ),
        compiler_params=pltpu.CompilerParams(
            dimension_semantics=("parallel",),
            vmem_limit_bytes=32 * 1024 * 1024),
        cost_estimate=cost,
    )(x_pad, w1, b1, w2, b2, w3, b3, w4, b4)

    return out[:B] if b_pad != B else out


def init_params(key, state_size, action_size):
    """Init mirroring PlayerBehaviorNetwork layer shapes.

    PyTorch Linear weight is (out, in); we store (in, out) so the kernel
    computes x @ W + b directly.
    """
    dims = [(state_size, 256), (256, 128), (128, 64), (64, action_size)]
    params = {}
    for idx, (fan_in, fan_out) in enumerate(dims, start=1):
        key, kw, kb = jax.random.split(key, 3)
        bound = 1.0 / jnp.sqrt(fan_in)
        params[f"w{idx}"] = jax.random.uniform(
            kw, (fan_in, fan_out), jnp.float32, -bound, bound)
        params[f"b{idx}"] = jax.random.uniform(
            kb, (1, fan_out), jnp.float32, -bound, bound)
    return params


def reference_forward(x, params):
    """Pure-JAX reference matching the kernel's bf16-matmul / f32-accumulate path."""
    def lin(h, w, b):
        return jnp.dot(h.astype(jnp.bfloat16), w.astype(jnp.bfloat16),
                       preferred_element_type=jnp.float32) + b
    h = jnp.maximum(lin(x, params["w1"], params["b1"]), 0.0)
    h = jnp.maximum(lin(h, params["w2"], params["b2"]), 0.0)
    h = jnp.maximum(lin(h, params["w3"], params["b3"]), 0.0)
    return lin(h, params["w4"], params["b4"])


if __name__ == "__main__":
    key = jax.random.PRNGKey(0)
    key, kx, kp = jax.random.split(key, 3)

    batch = 24          # ragged vs tile -> exercises batch padding + row slicing
    state_size = 32
    action_size = 10    # non-multiple of 128 -> exercises lane-sliced narrow store

    x = jax.random.normal(kx, (batch, state_size), jnp.float32)
    params = init_params(kp, state_size, action_size)

    # Parameter prep (bf16 cast + lane padding) is hoisted out of the call path.
    prepped, act = prepare_params(params)

    # Small explicit batch_tile so the demo runs a multi-step "parallel" grid.
    out = player_behavior_forward(x, prepped, act, batch_tile=16)
    out = jax.block_until_ready(out)

    ref = reference_forward(x, params)
    assert out.shape == (batch, action_size), out.shape
    assert jnp.allclose(out, ref, atol=2e-3, rtol=2e-3), "mismatch vs JAX reference"

    print("KERNEL_OK")
</pallas_src>

<mosaic_0001>
module attributes {stable_mosaic.version = 11 : i64} {
  func.func @_mlp_kernel(%arg0: i32, %arg1: memref<16x32xbf16, #tpu.memory_space<vmem>>, %arg2: memref<32x256xbf16, #tpu.memory_space<vmem>>, %arg3: memref<1x256xf32, #tpu.memory_space<vmem>>, %arg4: memref<256x128xbf16, #tpu.memory_space<vmem>>, %arg5: memref<1x128xf32, #tpu.memory_space<vmem>>, %arg6: memref<128x128xbf16, #tpu.memory_space<vmem>>, %arg7: memref<1x128xf32, #tpu.memory_space<vmem>>, %arg8: memref<128x128xbf16, #tpu.memory_space<vmem>>, %arg9: memref<1x128xf32, #tpu.memory_space<vmem>>, %arg10: memref<16x10xf32, #tpu.memory_space<vmem>>) attributes {dimension_semantics = [#tpu.dimension_semantics<parallel>], iteration_bounds = array<i64: 2>, scalar_prefetch = 0 : i64, scratch_operands = 0 : i64, tpu.core_type = #tpu.core_type<tc>, window_params = [{transform_indices = @transform_0, window_bounds = array<i64: 16, 32>}, {pipeline_mode = #tpu.pipeline_mode<synchronous>, transform_indices = @transform_1, window_bounds = array<i64: 32, 256>}, {pipeline_mode = #tpu.pipeline_mode<synchronous>, transform_indices = @transform_2, window_bounds = array<i64: 1, 256>}, {pipeline_mode = #tpu.pipeline_mode<synchronous>, transform_indices = @transform_3, window_bounds = array<i64: 256, 128>}, {pipeline_mode = #tpu.pipeline_mode<synchronous>, transform_indices = @transform_4, window_bounds = array<i64: 1, 128>}, {pipeline_mode = #tpu.pipeline_mode<synchronous>, transform_indices = @transform_5, window_bounds = array<i64: 128, 128>}, {pipeline_mode = #tpu.pipeline_mode<synchronous>, transform_indices = @transform_6, window_bounds = array<i64: 1, 128>}, {pipeline_mode = #tpu.pipeline_mode<synchronous>, transform_indices = @transform_7, window_bounds = array<i64: 128, 128>}, {pipeline_mode = #tpu.pipeline_mode<synchronous>, transform_indices = @transform_8, window_bounds = array<i64: 1, 128>}, {transform_indices = @transform_9, window_bounds = array<i64: 16, 10>}]} {
    %c0 = arith.constant 0 : index
    %c0_0 = arith.constant 0 : index
    %0 = vector.load %arg1[%c0, %c0_0] : memref<16x32xbf16, #tpu.memory_space<vmem>>, vector<16x32xbf16>
    %c0_1 = arith.constant 0 : index
    %c0_2 = arith.constant 0 : index
    %1 = vector.load %arg2[%c0_1, %c0_2] : memref<32x256xbf16, #tpu.memory_space<vmem>>, vector<32x256xbf16>
    %cst = arith.constant dense<0.000000e+00> : vector<16x256xf32>
    %2 = tpu.matmul %0, %1, %cst {dimension_numbers = #tpu.dot_dimension_numbers<[1], [0], [0], [1], [0, 0, 1, 1], [], []>} : vector<16x32xbf16>, vector<32x256xbf16>, vector<16x256xf32> -> vector<16x256xf32>
    %c0_3 = arith.constant 0 : index
    %c0_4 = arith.constant 0 : index
    %3 = vector.load %arg3[%c0_3, %c0_4] : memref<1x256xf32, #tpu.memory_space<vmem>>, vector<1x256xf32>
    %4 = vector.broadcast %3 : vector<1x256xf32> to vector<16x256xf32>
    %5 = arith.addf %2, %4 : vector<16x256xf32>
    %cst_5 = arith.constant 0.000000e+00 : f32
    %6 = vector.broadcast %cst_5 : f32 to vector<16x256xf32>
    %7 = arith.maximumf %5, %6 : vector<16x256xf32>
    %8 = arith.truncf %7 : vector<16x256xf32> to vector<16x256xbf16>
    %c0_6 = arith.constant 0 : index
    %c0_7 = arith.constant 0 : index
    %9 = vector.load %arg4[%c0_6, %c0_7] : memref<256x128xbf16, #tpu.memory_space<vmem>>, vector<256x128xbf16>
    %cst_8 = arith.constant dense<0.000000e+00> : vector<16x128xf32>
    %10 = tpu.matmul %8, %9, %cst_8 {dimension_numbers = #tpu.dot_dimension_numbers<[1], [0], [0], [1], [0, 0, 1, 1], [], []>} : vector<16x256xbf16>, vector<256x128xbf16>, vector<16x128xf32> -> vector<16x128xf32>
    %c0_9 = arith.constant 0 : index
    %c0_10 = arith.constant 0 : index
    %11 = vector.load %arg5[%c0_9, %c0_10] : memref<1x128xf32, #tpu.memory_space<vmem>>, vector<1x128xf32>
    %12 = vector.broadcast %11 : vector<1x128xf32> to vector<16x128xf32>
    %13 = arith.addf %10, %12 : vector<16x128xf32>
    %cst_11 = arith.constant 0.000000e+00 : f32
    %14 = vector.broadcast %cst_11 : f32 to vector<16x128xf32>
    %15 = arith.maximumf %13, %14 : vector<16x128xf32>
    %16 = arith.truncf %15 : vector<16x128xf32> to vector<16x128xbf16>
    %c0_12 = arith.constant 0 : index
    %c0_13 = arith.constant 0 : index
    %17 = vector.load %arg6[%c0_12, %c0_13] : memref<128x128xbf16, #tpu.memory_space<vmem>>, vector<128x128xbf16>
    %cst_14 = arith.constant dense<0.000000e+00> : vector<16x128xf32>
    %18 = tpu.matmul %16, %17, %cst_14 {dimension_numbers = #tpu.dot_dimension_numbers<[1], [0], [0], [1], [0, 0, 1, 1], [], []>} : vector<16x128xbf16>, vector<128x128xbf16>, vector<16x128xf32> -> vector<16x128xf32>
    %c0_15 = arith.constant 0 : index
    %c0_16 = arith.constant 0 : index
    %19 = vector.load %arg7[%c0_15, %c0_16] : memref<1x128xf32, #tpu.memory_space<vmem>>, vector<1x128xf32>
    %20 = vector.broadcast %19 : vector<1x128xf32> to vector<16x128xf32>
    %21 = arith.addf %18, %20 : vector<16x128xf32>
    %cst_17 = arith.constant 0.000000e+00 : f32
    %22 = vector.broadcast %cst_17 : f32 to vector<16x128xf32>
    %23 = arith.maximumf %21, %22 : vector<16x128xf32>
    %24 = arith.truncf %23 : vector<16x128xf32> to vector<16x128xbf16>
    %c0_18 = arith.constant 0 : index
    %c0_19 = arith.constant 0 : index
    %25 = vector.load %arg8[%c0_18, %c0_19] : memref<128x128xbf16, #tpu.memory_space<vmem>>, vector<128x128xbf16>
    %cst_20 = arith.constant dense<0.000000e+00> : vector<16x128xf32>
    %26 = tpu.matmul %24, %25, %cst_20 {dimension_numbers = #tpu.dot_dimension_numbers<[1], [0], [0], [1], [0, 0, 1, 1], [], []>} : vector<16x128xbf16>, vector<128x128xbf16>, vector<16x128xf32> -> vector<16x128xf32>
    %c0_21 = arith.constant 0 : index
    %c0_22 = arith.constant 0 : index
    %27 = vector.load %arg9[%c0_21, %c0_22] : memref<1x128xf32, #tpu.memory_space<vmem>>, vector<1x128xf32>
    %28 = vector.broadcast %27 : vector<1x128xf32> to vector<16x128xf32>
    %29 = arith.addf %26, %28 : vector<16x128xf32>
    %30 = vector.extract_strided_slice %29 {offsets = [0, 0], sizes = [16, 10], strides = [1, 1]} : vector<16x128xf32> to vector<16x10xf32>
    %c0_23 = arith.constant 0 : index
    %c0_24 = arith.constant 0 : index
    %31 = vector.load %arg10[%c0_23, %c0_24] : memref<16x10xf32, #tpu.memory_space<vmem>>, vector<16x10xf32>
    tpu.vector_store %arg10[%c0_23, %c0_24], %30 {strides = array<i32>} : memref<16x10xf32, #tpu.memory_space<vmem>>, vector<16x10xf32>,
    return
  }
  func.func @transform_0(%arg0: i32) -> (i32, i32) {
    %c0_i32 = arith.constant 0 : i32
    %c0_i32_0 = arith.constant 0 : i32
    return %arg0, %c0_i32 : i32, i32
  }
  func.func @transform_1(%arg0: i32) -> (i32, i32) {
    %c0_i32 = arith.constant 0 : i32
    %c0_i32_0 = arith.constant 0 : i32
    %c0_i32_1 = arith.constant 0 : i32
    return %c0_i32, %c0_i32_0 : i32, i32
  }
  func.func @transform_2(%arg0: i32) -> (i32, i32) {
    %c0_i32 = arith.constant 0 : i32
    %c0_i32_0 = arith.constant 0 : i32
    %c0_i32_1 = arith.constant 0 : i32
    return %c0_i32, %c0_i32_0 : i32, i32
  }
  func.func @transform_3(%arg0: i32) -> (i32, i32) {
    %c0_i32 = arith.constant 0 : i32
    %c0_i32_0 = arith.constant 0 : i32
    %c0_i32_1 = arith.constant 0 : i32
    return %c0_i32, %c0_i32_0 : i32, i32
  }
  func.func @transform_4(%arg0: i32) -> (i32, i32) {
    %c0_i32 = arith.constant 0 : i32
    %c0_i32_0 = arith.constant 0 : i32
    %c0_i32_1 = arith.constant 0 : i32
    return %c0_i32, %c0_i32_0 : i32, i32
  }
  func.func @transform_5(%arg0: i32) -> (i32, i32) {
    %c0_i32 = arith.constant 0 : i32
    %c0_i32_0 = arith.constant 0 : i32
    %c0_i32_1 = arith.constant 0 : i32
    return %c0_i32, %c0_i32_0 : i32, i32
  }
  func.func @transform_6(%arg0: i32) -> (i32, i32) {
    %c0_i32 = arith.constant 0 : i32
    %c0_i32_0 = arith.constant 0 : i32
    %c0_i32_1 = arith.constant 0 : i32
    return %c0_i32, %c0_i32_0 : i32, i32
  }
  func.func @transform_7(%arg0: i32) -> (i32, i32) {
    %c0_i32 = arith.constant 0 : i32
    %c0_i32_0 = arith.constant 0 : i32
    %c0_i32_1 = arith.constant 0 : i32
    return %c0_i32, %c0_i32_0 : i32, i32
  }
  func.func @transform_8(%arg0: i32) -> (i32, i32) {
    %c0_i32 = arith.constant 0 : i32
    %c0_i32_0 = arith.constant 0 : i32
    %c0_i32_1 = arith.constant 0 : i32
    return %c0_i32, %c0_i32_0 : i32, i32
  }
  func.func @transform_9(%arg0: i32) -> (i32, i32) {
    %c0_i32 = arith.constant 0 : i32
    %c0_i32_0 = arith.constant 0 : i32
    return %arg0, %c0_i32 : i32, i32
  }
}

</mosaic_0001>

<bundles_post_ra>
// kernel: tpu_custom_call.1
= control target key start
LH: loop header
LB: loop body
LE: loop exit
PB: predicated region body
PF: predicated region fallthrough
CT: control target
= control target key end

     0   :  { %14 = vsyncpa [#allocation3], 0  ;;  %s1733_s0 = inlined_call_operand.hbm [shape: bf16[32,32], index: 0, kind: input, shape index: {}]   ;;  %s1734_s1 = inlined_call_operand.hbm [shape: bf16[32,256], index: 1, kind: input, shape index: {}]   ;;  %s1735_s2 = inlined_call_operand.vmem [shape: f32[1,256], index: 2, kind: input, shape index: {}]   ;;  %s1736_s3 = inlined_call_operand.hbm [shape: bf16[256,128], index: 3, kind: input, shape index: {}]   ;;  %s1737_s4 = inlined_call_operand.vmem [shape: f32[1,128], index: 4, kind: input, shape index: {}]   ;;  %s1738_s5 = inlined_call_operand.hbm [shape: bf16[128,128], index: 5, kind: input, shape index: {}]   ;;  %s1739_s6 = inlined_call_operand.vmem [shape: f32[1,128], index: 6, kind: input, shape index: {}]   ;;  %s1740_s7 = inlined_call_operand.hbm [shape: bf16[128,128], index: 7, kind: input, shape index: {}]   ;;  %s1741_s8 = inlined_call_operand.vmem [shape: f32[1,128], index: 8, kind: input, shape index: {}]   ;;  %s1742_s9 = inlined_call_operand.vmem [shape: f32[32,10], index: 9, kind: output, shape index: {}]  }
   0x1   :  { %16 = vsyncpa [#allocation3 + $0x1], 0 }
   0x2   :  { %17 = vsyncpa [#allocation5], 0 }
   0x3   :  { %18 = vsyncpa [#allocation8], 0  ;;  %s1531_s30 = smov 0   ;;  %s1533_s10 = smov 0  }
   0x4   :  { %s1535_s11 = smov 0   ;;  %s1537_s12 = smov 0  }
   0x5 LB: > { %s1743_s13 = sadd.s32 4294967295, %s1467_s12   ;;  %p44_p0 = scmp.ne.s32.totalorder %s1459_s10, %s1455_s30  ;;  %s1467_s12 = sphi %s1537_s12, %s1764_s12   ;;  %s1463_s11 = sphi %s1535_s11, %s1763_s11   ;;  %s1459_s10 = sphi %s1533_s10, %s1762_s10   ;;  %s1455_s30 = sphi %s1531_s30, %s1761_s30  }
   0x6   : > { %p1553_p1 = scmp.eq.s32.totalorder %s1743_s13, 0  ;;  %p1026_p2 = scmp.ge.s32.totalorder %s1467_s12, 1 }
   0x7   : > { %p249_p3 = scmp.lt.s32.totalorder %s1467_s12, 3  ;;  %s1469_s17 = smov [#allocation4]  }
   0x8   : > { %s1750_s14 = scalar_select %p1553_p1, 1, 0 }
   0x9   : > { %p1561_p4 = por %p1553_p1, %p44_p0  ;;  %p1565_p5 = pnand %p1026_p2, %p249_p3 }
   0xa   : > { %s261_s18 = sshll.u32 %s1469_s17, 4  ;;  %s1470_s20 = smov [#allocation7]   ;;  %s262_s18 = int_to_ptr.vmem [resolvable:$true] %s261_s18 }
   0xb   : > { %s1751_s15 = scalar_select %p1561_p4, 1, 0 }
   0xc   : > { %s1752_s16 = scalar_select %p1565_p5, 1, 0 }
   0xd   : > { %p1185_p6 = pneg %p1565_p5  ;;  %s293_s21 = sshll.u32 %s1470_s20, 4  ;;  %s294_s21 = int_to_ptr.vmem [resolvable:$true] %s293_s21 }
   0xe   : > { %s1304_s22 = scalar_lea.vmem %s262_s18, 512  ;;  %p1312_p12 = scmp.lt.s32.totalorder %s262_s18, %s262_s18 }
   0xf   : > { %p1573_p7 = pnand %p1185_p6, %p1553_p1  ;;  %p1305_p9 = scmp.ne.s32.totalorder %s262_s18, %s1304_s22 }
  0x10   : > { %p1313_p13 = scmp.lt.s32.totalorder %s1304_s22, %s1304_s22 }
  0x11   : > { %p1295_p8 = pneg %p1573_p7 }
  0x12   : > { %p1314_p0 = por %p1313_p13, %p1312_p12 }
  0x13   : > { %p1307_p10 = pnand %p1305_p9, %p1295_p8 }
  0x15   : > { %p1308_p11 = pneg %p1307_p10 }
  0x17   : > { %p1315_p2 = pnand %p1314_p0, %p1308_p11 }
  0x19   : > { %1318 = shalt.err (!%p1315_p2)
}
  0x1a   : > { %s1471_s23 = smov 128   ;;  %s1472_s24 = smov 8  }
  0x1b   : > { %1188 = dma.hbm_to_vmem [thread:$0]  (!%p1573_p7), %s1734_s1, 512, %s262_s18, [#allocation5], %s1471_s23, %s1471_s23, %s1472_s24  }
  0x1c   : > { %s1473_s27 = smov [#allocation6]   ;;  %s1330_s29 = scalar_lea.vmem %s294_s21, 1024 }
  0x1d   : > { %s277_s28 = sshll.u32 %s1473_s27, 4  ;;  %p1331_p3 = scmp.ne.s32.totalorder %s294_s21, %s1330_s29  ;;  %s278_s28 = int_to_ptr.vmem [resolvable:$true] %s277_s28 }
  0x1e   : > { %p1338_p10 = scmp.lt.s32.totalorder %s294_s21, %s294_s21  ;;  %p1339_p11 = scmp.lt.s32.totalorder %s1330_s29, %s1330_s29 }
  0x1f   : > { %p1333_p6 = pnand %p1331_p3, %p1295_p8 }
  0x20   : > { %p1340_p12 = por %p1339_p11, %p1338_p10 }
  0x21   : > { %p1334_p9 = pneg %p1333_p6 }
  0x23   : > { %p1341_p13 = pnand %p1340_p12, %p1334_p9 }
  0x25   : > { %1344 = shalt.err (!%p1341_p13)
}
  0x26   : > { %s1744_s30 = smov 64   ;;  %s1745_s17 = smov 4  }
  0x27   : > { %1194 = dma.hbm_to_vmem [thread:$0]  (!%p1573_p7), %s1738_s5, 1024, %s294_s21, [#allocation8], %s1744_s30, %s1744_s30, %s1745_s17  }
  0x28   : > { %s1356_s22 = scalar_lea.vmem %s278_s28, 2048  ;;  %p1364_p6 = scmp.lt.s32.totalorder %s278_s28, %s278_s28 }
  0x29   : > { %p1357_p0 = scmp.ne.s32.totalorder %s278_s28, %s1356_s22  ;;  %p1365_p9 = scmp.lt.s32.totalorder %s1356_s22, %s1356_s22 }
  0x2b   : > { %p1359_p2 = pnand %p1357_p0, %p1295_p8  ;;  %p1366_p10 = por %p1365_p9, %p1364_p6 }
  0x2d   : > { %p1360_p3 = pneg %p1359_p2 }
  0x2f   : > { %p1367_p11 = pnand %p1366_p10, %p1360_p3 }
  0x31   : > { %1370 = shalt.err (!%p1367_p11)
}
  0x32   : > { %1191 = dma.hbm_to_vmem [thread:$0]  (!%p1573_p7), %s1736_s3, 2048, %s278_s28, [#allocation5], %s1744_s30, %s1744_s30, %s1745_s17  }
  0x33   : > { %s1476_s21 = smov [#allocation9]  }
  0x34   : > { %s309_s25 = sshll.u32 %s1476_s21, 4  ;;  %s310_s25 = int_to_ptr.vmem [resolvable:$true] %s309_s25 }
  0x35   : > { %s1382_s26 = scalar_lea.vmem %s310_s25, 1024  ;;  %p1390_p2 = scmp.lt.s32.totalorder %s310_s25, %s310_s25 }
  0x36   : > { %p1383_p12 = scmp.ne.s32.totalorder %s310_s25, %s1382_s26  ;;  %p1391_p3 = scmp.lt.s32.totalorder %s1382_s26, %s1382_s26 }
  0x38   : > { %p1385_p13 = pnand %p1383_p12, %p1295_p8  ;;  %p1392_p6 = por %p1391_p3, %p1390_p2 }
  0x3a   : > { %p1386_p0 = pneg %p1385_p13 }
  0x3c   : > { %p1393_p9 = pnand %p1392_p6, %p1386_p0 }
  0x3e   : > { %1396 = shalt.err (!%p1393_p9)
}
  0x3f   : > { %1197 = dma.hbm_to_vmem [thread:$0]  (!%p1573_p7), %s1740_s7, 1024, %s310_s25, [#allocation8], %s1744_s30, %s1744_s30, %s1745_s17  }
  0x40   : > { %s1621_s29 = sadd.s32 1, %s1467_s12   ;;  %s31_s19 = sadd.s32 1, %s1463_s11 }
  0x41   : > { %s28_s18 = ssub.s32 %s1467_s12, %s1621_s29  ;;  %p38_p8 = scmp.ne.s32.totalorder %s1463_s11, %s1459_s10 }
  0x42   : > { %p29_p10 = scmp.eq.s32.totalorder %s28_s18, 0  ;;  %p39_p11 = scmp.eq.s32.totalorder %s1467_s12, 0 }
  0x43   : > { %p1206_p12 = scmp.lt.s32.totalorder %s1467_s12, 2  ;;  %s326_s20 = sand.u32 1, %s1463_s11  }
  0x44   : > { %s1632_s22 = scalar_select %p29_p10, %s1463_s11, %s31_s19  }
  0x45   : > { %p40_p13 = por %p39_p11, %p38_p8  ;;  %s1032_s23 = sshll.u32 %s326_s20, 3 }
  0x46   : > { %s1086_s24 = sshll.u32 %s1467_s12, 7  ;;  %s330_s25 = scalar_lea.vmem [#allocation2], %s1032_s23 }
  0x47   : > { %s1638_s27 = scalar_lea.hbm %s1733_s0, %s1086_s24  ;;  %s337_s28 = sshll.u32 %s330_s25, 4  ;;  %s1644_s28 = int_to_ptr.vmem [resolvable:$true] %s337_s28 }
  0x48   : > { %p1640_p7 = pnand %p1206_p12, %p40_p13  ;;  %s1646_s19 = scalar_lea.sflag [#allocation3], %s326_s20 }
  0x49   : > { %s1397_s13 = scalar_lea.hbm %s1638_s27, 128  ;;  %s1402_s23 = scalar_lea.hbm %s1733_s0, 256 }
  0x4a   : > { %p1398_p0 = scmp.ne.s32.totalorder %s1638_s27, %s1397_s13  ;;  %p1399_p2 = pneg %p1640_p7 }
  0x4b   : > { %p1403_p9 = scmp.lt.s32.totalorder %s1638_s27, %s1733_s0  ;;  %p1404_p8 = scmp.lt.s32.totalorder %s1402_s23, %s1397_s13 }
  0x4c   : > { %p1400_p3 = pnand %p1399_p2, %p1398_p0 }
  0x4d   : > { %p1405_p10 = por %p1404_p8, %p1403_p9 }
  0x4e   : > { %p1401_p6 = pneg %p1400_p3 }
  0x50   : > { %p1406_p11 = pnand %p1405_p10, %p1401_p6 }
  0x52   : > { %1409 = shalt.err (!%p1406_p11)
}
  0x53   : > { %s1410_s20 = scalar_lea.vmem %s1644_s28, 128  ;;  %s1477_s30 = smov [#allocation2]  }
  0x54   : > { %p1411_p12 = scmp.ne.s32.totalorder %s1644_s28, %s1410_s20  ;;  %s1415_s17 = sshll.u32 %s1477_s30, 4  ;;  %s1416_s17 = int_to_ptr.vmem [resolvable:$false] %s1415_s17 }
  0x55   : > { %s1417_s24 = scalar_lea.vmem %s1416_s17, 256  ;;  %p1418_p3 = scmp.lt.s32.totalorder %s1644_s28, %s1416_s17 }
  0x56   : > { %p1413_p13 = pnand %p1411_p12, %p1399_p2  ;;  %p1419_p1 = scmp.lt.s32.totalorder %s1417_s24, %s1410_s20 }
  0x58   : > { %p1414_p0 = pneg %p1413_p13  ;;  %p1420_p4 = por %p1419_p1, %p1418_p3 }
  0x5a   : > { %p1421_p5 = pnand %p1420_p4, %p1414_p0 }
  0x5c   : > { %1424 = shalt.err (!%p1421_p5)
}
  0x5d   : > { %s1755_s13 = smov 4   ;;  %s1756_s21 = smov 64  }
  0x5e   : > { %1201 = dma.hbm_to_vmem [thread:$0]  (!%p1640_p7), %s1638_s27, 128, %s1644_s28, %s1646_s19, %s1756_s21, %s1756_s21, %s1755_s13  }
  0x5f   : > { %p1757_p2 = scmp.ne.s32.totalorder %s1752_s16, 0 }
  0x60   : > { %s351_s30 = sand.u32 (!%p1757_p2), 1, %s1459_s10   ;;  %p1758_p1 = scmp.ne.s32.totalorder (!%p1757_p2), %s1751_s15, 0 }
  0x61   : > { %349 = sbr.rel (%p1757_p2) target bundleno = 933 (0x3a5), region = 56  ;;  %s1036_s17 = sshll.u32 (!%p1757_p2), %s351_s30, 3 }
  0x62   : > { %s352_s23 = scalar_lea.sflag (!%p1757_p2), [#allocation3], %s351_s30  ;;  %s355_s26 = scalar_lea.vmem (!%p1757_p2), [#allocation2], %s1036_s17 }
  0x66   : > { %1442 = dma.done.wait (%p1758_p1), %s352_s23, 128  }
  0x67   : > { %1444 = vsyncadd (%p1758_p1), %s352_s23, 4294967168  ;;  %p1759_p4 = scmp.ne.s32.totalorder %s1750_s14, 0 }
  0x69   : > { %1446 = dma.done.wait (%p1759_p4), [#allocation5], 2560  }
  0x6a   : > { %1448 = vsyncadd (%p1759_p4), [#allocation5], 4294964736 }
  0x6b   : > { %1450 = dma.done.wait (%p1759_p4), [#allocation8], 2048  }
  0x6c   : > { %1452 = vsyncadd (%p1759_p4), [#allocation8], 4294965248  ;;  %v1478_v0 = vmov 0   ;;  %v1254_v1 = vld [vmem:[#allocation4 + $0x14] ss:$8 sps:$4 sm:$0xff]   ;;  %vm457_vm0 = vcmask 261120   ;;  %v422_v27 = vlaneseq }
  0x6d   : > { %493 = vmatprep.mubr.bf16.mxu0 %v1478_v0  ;;  %v1256_v2 = vld [vmem:[#allocation4 + $0x10] ss:$8 sps:$4 sm:$0xff]   ;;  %473 = vmatprep.subr.bf16.mxu0 %v1254_v1  ;;  %v1257_v3 = vld [vmem:[#allocation4 + $0x4] ss:$8 sps:$4 sm:$0xff]   ;;  %v1259_v4 = vld [vmem:[#allocation4] ss:$8 sps:$4 sm:$0xff]  }
  0x6e   : > { %474 = vmatpush1.bf16.msra.mxu0 %v1256_v2  ;;  %v1260_v5 = vld [vmem:[%s355_s26] sm:$0xff]   ;;  %v1265_v10 = vld [vmem:[#allocation6 + $0x68] sm:$0xff]   ;;  %v1267_v12 = vld [vmem:[#allocation6 + $0x60] sm:$0xff]   ;;  %v1479_v23 = vmov 0.0   ;;  %v423_v28 = vshrl.u32 %v422_v27, 7  ;;  %vm1480_vm1 = vmmov 0  }
  0x6f   : > { %475 = vmatprep.subr.bf16.mxu0 %v1257_v3  ;;  %v1261_v6 = vld [vmem:[#allocation6 + $0x78] sm:$0xff]   ;;  %v1263_v8 = vld [vmem:[#allocation6 + $0x70] sm:$0xff]   ;;  %v1266_v11 = vld [vmem:[#allocation6 + $0x28] sm:$0xff]   ;;  %s1760_s19 = sadd.s32 4294967295, %s1467_s12   ;;  %vm916_vm2 = vcmask 80896  }
  0x70   : > { %v1262_v7 = vld [vmem:[#allocation6 + $0x38] sm:$0xff]   ;;  %1087 = vmatprep.subr.bf16.mxu1 %v1261_v6  ;;  %v1264_v9 = vld [vmem:[#allocation6 + $0x30] sm:$0xff]   ;;  %v1268_v13 = vld [vmem:[#allocation6 + $0x20] sm:$0xff]   ;;  %v428_v29 = vsub.s32 1, %v423_v28  ;;  %v424_v30 = vsub.s32 0, %v423_v28  ;;  %s1041_s25 = sshll.u32 %s1760_s19, 1 }
  0x71   : > { %1088 = vmatpush3.bf16.msra.mxu1 %v1262_v7  ;;  %v1269_v14 = vld [vmem:[#allocation6 + $0x58] sm:$0xff]   ;;  %v1271_v16 = vld [vmem:[#allocation6 + $0x50] sm:$0xff]   ;;  %v1273_v18 = vld [vmem:[#allocation6 + $0x48] sm:$0xff]   ;;  %p408_p5 = scmp.lt.s32.totalorder %s1041_s25, 3 }
  0x72   : > { %476 = vmatpush1.bf16.msra.mxu0 %v1259_v4  ;;  %1089 = vmatprep.subr.bf16.mxu1 %v1263_v8  ;;  %v1270_v15 = vld [vmem:[#allocation6 + $0x18] sm:$0xff]   ;;  %v1272_v17 = vld [vmem:[#allocation6 + $0x10] sm:$0xff]   ;;  %v1274_v19 = vld [vmem:[#allocation6 + $0x8] sm:$0xff]  }
  0x73   : > { %v1275_v20 = vld [vmem:[#allocation6 + $0x40] sm:$0xff]   ;;  %v1277_v22 = vld [vmem:[#allocation7 + $0x38] sm:$0xff]   ;;  %1127 = vmatprep.subr.bf16.mxu0 %v1479_v23  ;;  %v1278_v24 = vld [vmem:[#allocation7 + $0x30] sm:$0xff]   ;;  %s1766_s25 = smov (!%p408_p5, %s1041_s25), 3 }
  0x74   : > { %v1276_v21 = vld [vmem:[#allocation6] sm:$0xff]   ;;  %v1279_v25 = vld [vmem:[#allocation7 + $0x28] sm:$0xff]   ;;  %v420_v31 = vld [vmem:[%s1735_s2] sm:$0x3]  ;;  %s1042_s20 = sshll.u32 %s1766_s25, 3 }
  0x75   : > { %1048 = vmatmul.mubr.msk.bf16.vlgmr.msra.gmra.mxu0 %vm457_vm0, %v1260_v5  ;;  %1090 = vmatpush3.bf16.msra.mxu1 %v1264_v9  ;;  %v1280_v26 = vld [vmem:[#allocation7 + $0x20] sm:$0xff]   ;;  %v429_v33 = vrot.slane %v420_v31, %v428_v29  ;;  %v425_v34 = vrot.slane %v420_v31, %v424_v30  ;;  %v1281_v48 = vld [vmem:[#allocation7 + $0x18] sm:$0xff]   ;;  %v1282_v49 = vld [vmem:[#allocation7 + $0x10] sm:$0xff]   ;;  %s411_s17 = scalar_lea.vmem %s1742_s9, %s1042_s20 }
  0x76   : > { %1091 = vmatprep.subr.bf16.mxu1 %v1265_v10  ;;  %1128 = vmatpush3.bf16.msra.mxu0 %v1277_v22  ;;  %v1283_v50 = vld [vmem:[#allocation7 + $0x8] sm:$0xff]   ;;  %v1284_v51 = vld [vmem:[#allocation7] sm:$0xff]   ;;  %v1285_v52 = vld [vmem:[#allocation9 + $0x38] sm:$0xff]  }
  0x77   : > { %1129 = vmatprep.subr.bf16.mxu0 %v1479_v23  ;;  %1143 = vmatprep.mubr.msk.bf16.mxu0 %vm1480_vm1, %v1479_v23  ;;  %v1286_v53 = vld [vmem:[#allocation9 + $0x30] sm:$0xff]   ;;  %v1287_v54 = vld [vmem:[#allocation9 + $0x28] sm:$0xff]   ;;  %v1288_v55 = vld [vmem:[#allocation9 + $0x20] sm:$0xff]  }
  0x78   : > { %v1289_v56 = vld [vmem:[#allocation9 + $0x18] sm:$0xff]   ;;  %v1049_v60 = vld [vmem:[%s1737_s4] ss:$0 sm:$0xff]  ;;  %v1291_v6 = vld [vmem:[#allocation9 + $0x8] sm:$0xff]  }
  0x79   : > { %1092 = vmatpush3.bf16.msra.mxu1 %v1266_v11  ;;  %v1290_v5 = vld [vmem:[#allocation9 + $0x10] sm:$0xff]   ;;  %v1292_v7 = vld [vmem:[#allocation9] sm:$0xff]  }
  0x7a   : > { %1093 = vmatprep.subr.bf16.mxu1 %v1267_v12  ;;  %1130 = vmatpush3.bf16.msra.mxu0 %v1278_v24  ;;  %v1066_v8 = vld [vmem:[%s1739_s6] ss:$0 sm:$0xff] }
  0x7b   : > { %1131 = vmatprep.subr.bf16.mxu0 %v1479_v23 }
  0x7d   : > { %1094 = vmatpush3.bf16.msra.mxu1 %v1268_v13 }
  0x7e   : > { %1095 = vmatprep.subr.bf16.mxu1 %v1269_v14  ;;  %1132 = vmatpush3.bf16.msra.mxu0 %v1279_v25 }
  0x7f   : > { %1133 = vmatprep.subr.bf16.mxu0 %v1479_v23 }
  0x81   : > { %1096 = vmatpush3.bf16.msra.mxu1 %v1270_v15 }
  0x82   : > { %1097 = vmatprep.subr.bf16.mxu1 %v1271_v16  ;;  %1134 = vmatpush3.bf16.msra.mxu0 %v1280_v26 }
  0x83   : > { %1135 = vmatprep.subr.bf16.mxu0 %v1479_v23 }
  0x85   : > { %1098 = vmatpush3.bf16.msra.mxu1 %v1272_v17 }
  0x86   : > { %1099 = vmatprep.subr.bf16.mxu1 %v1273_v18  ;;  %1136 = vmatpush3.bf16.msra.mxu0 %v1281_v48  ;;  %v1075_v18 = vld [vmem:[%s1741_s8] ss:$0 sm:$0xff] }
  0x87   : > { %1137 = vmatprep.subr.bf16.mxu0 %v1479_v23 }
  0x89   : > { %1100 = vmatpush3.bf16.msra.mxu1 %v1274_v19 }
  0x8a   : > { %1101 = vmatprep.subr.bf16.mxu1 %v1275_v20  ;;  %1138 = vmatpush3.bf16.msra.mxu0 %v1282_v49 }
  0x8b   : > { %1139 = vmatprep.subr.bf16.mxu0 %v1479_v23 }
  0x8d   : > { %1102 = vmatpush3.bf16.msra.mxu1 %v1276_v21 }
  0x8e   : > { %1147 = vmatprep.subr.bf16.mxu1 %v1479_v23  ;;  %1140 = vmatpush3.bf16.msra.mxu0 %v1283_v50 }
  0x8f   : > { %1141 = vmatprep.subr.bf16.mxu0 %v1479_v23 }
  0x92   : > { %1142 = vmatpush3.bf16.msra.mxu0 %v1284_v51 }
 0x135   : > { %v495_v32 = vpop.f32.mrf.mxu0 }
 0x136   : > { %v496_v39 = vadd.f32 %v495_v32, %v425_v34 }
 0x137   : > { %v497_v35 = vpop.f32.mrf.mxu0 }
 0x138   : > { %v498_v37 = vadd.f32 %v497_v35, %v429_v33  ;;  %v504_v45 = vmax.f32 %v496_v39, 0.0 }
 0x139   : > { %v499_v36 = vpop.f32.mrf.mxu0 }
 0x13a   : > { %v500_v38 = vadd.f32 %v499_v36, %v425_v34  ;;  %v505_v43 = vmax.f32 %v498_v37, 0.0 }
 0x13b   : > { %v501_v40 = vpop.f32.mrf.mxu0 }
 0x13c   : > { %v502_v41 = vadd.f32 %v501_v40, %v429_v33  ;;  %v506_v42 = vmax.f32 %v500_v38, 0.0 }
 0x13e   : > { %v507_v44 = vmax.f32 %v502_v41, 0.0  ;;  %v508_v47 = vpack.c.bf16 %v506_v42, %v504_v45 }
 0x140   : > { %v509_v46 = vpack.c.bf16 %v507_v44, %v505_v43 }
 0x142   : > { %677 = vmatprep.mubr.bf16.mxu1 %v509_v46 }
 0x143   : > { %678 = vmatmul.mubr.bf16.vlgmr.msra.gmra.mxu1 %v508_v47 }
 0x144   : > { %1163 = vmatprep.mubr.msk.bf16.mxu1 %vm1480_vm1, %v1479_v23  ;;  %1148 = vmatpush3.bf16.msra.mxu1 %v1285_v52 }
 0x145   : > { %1149 = vmatprep.subr.bf16.mxu1 %v1479_v23 }
 0x148   : > { %1150 = vmatpush3.bf16.msra.mxu1 %v1286_v53 }
 0x149   : > { %1151 = vmatprep.subr.bf16.mxu1 %v1479_v23 }
 0x14c   : > { %1152 = vmatpush3.bf16.msra.mxu1 %v1287_v54 }
 0x14d   : > { %1153 = vmatprep.subr.bf16.mxu1 %v1479_v23 }
 0x150   : > { %1154 = vmatpush3.bf16.msra.mxu1 %v1288_v55 }
 0x151   : > { %1155 = vmatprep.subr.bf16.mxu1 %v1479_v23 }
 0x154   : > { %1156 = vmatpush3.bf16.msra.mxu1 %v1289_v56 }
 0x155   : > { %1157 = vmatprep.subr.bf16.mxu1 %v1479_v23 }
 0x158   : > { %1158 = vmatpush3.bf16.msra.mxu1 %v1290_v5 }
 0x159   : > { %1159 = vmatprep.subr.bf16.mxu1 %v1479_v23 }
 0x15c   : > { %1160 = vmatpush3.bf16.msra.mxu1 %v1291_v6 }
 0x15d   : > { %1161 = vmatprep.subr.bf16.mxu1 %v1479_v23 }
 0x160   : > { %1162 = vmatpush3.bf16.msra.mxu1 %v1292_v7 }
 0x203   : > { %v1103_v57 = vpop.f32.mrf.mxu1 }
 0x205   : > { %v1104_v58 = vpop.f32.mrf.mxu1 }
 0x206   : > { %v1105_v59 = vadd.f32 %v1104_v58, %v1103_v57 }
 0x207   : > { %v1106_v61 = vpop.f32.mrf.mxu1 }
 0x208   : > { %v680_v63 = vadd.f32 %v1105_v59, %v1049_v60 }
 0x209   : > { %v1107_v62 = vpop.f32.mrf.mxu1 }
 0x20a   : > { %v1108_v0 = vadd.f32 %v1107_v62, %v1106_v61  ;;  %v686_v2 = vmax.f32 %v680_v63, 0.0 }
 0x20c   : > { %v683_v1 = vadd.f32 %v1108_v0, %v1049_v60 }
 0x20e   : > { %v687_v3 = vmax.f32 %v683_v1, 0.0 }
 0x210   : > { %v688_v4 = vpack.c.bf16 %v687_v3, %v686_v2 }
 0x212   : > { %1144 = vmatmul.mubr.bf16.vlgmr.msra.gmra.mxu0 %v688_v4 }
 0x2d2   : > { %v794_v9 = vpop.f32.mrf.mxu0 }
 0x2d3   : > { %v795_v11 = vadd.f32 %v1066_v8, %v794_v9 }
 0x2d4   : > { %v1145_v10 = vpop.f32.mrf.mxu0 }
 0x2d5   : > { %v801_v15 = vmax.f32 %v795_v11, 0.0 }
 0x2d6   : > { %v797_v12 = vpop.f32.mrf.mxu0 }
 0x2d7   : > { %v798_v13 = vadd.f32 %v1066_v8, %v797_v12 }
 0x2d8   : > { %v1146_v14 = vpop.f32.mrf.mxu0 }
 0x2d9   : > { %v802_v16 = vmax.f32 %v798_v13, 0.0 }
 0x2db   : > { %v803_v17 = vpack.c.bf16 %v802_v16, %v801_v15 }
 0x2dd   : > { %1164 = vmatmul.mubr.bf16.vlgmr.msra.gmra.mxu1 %v803_v17 }
 0x39d   : > { %v909_v19 = vpop.f32.mrf.mxu1 }
 0x39e   : > { %v910_v20 = vadd.f32 %v1075_v18, %v909_v19 }
 0x39f   : > { %v1165_v21 = vpop.f32.mrf.mxu1 }
 0x3a0   : > { %917 = vst.msk [vmem:[%s411_s17] sm:$0xff] %vm916_vm2, %v910_v20 }
 0x3a1   : > { %v912_v22 = vpop.f32.mrf.mxu1 }
 0x3a2   : > { %v913_v23 = vadd.f32 %v1075_v18, %v912_v22 }
 0x3a3   : > { %v1166_v24 = vpop.f32.mrf.mxu1 }
 0x3a4   : > { %918 = vst.msk [vmem:[%s411_s17 + $0x8] sm:$0xff] %vm916_vm2, %v913_v23 }
 0x3a5 PF: > { %p21_p7 = scmp.ge.s32.totalorder %s1621_s29, 4   ;;  %s1761_s30 = smov %s1459_s10 }
 0x3a6   : > { %s1762_s10 = smov %s1463_s11  ;;  %s1763_s11 = smov %s1632_s22 }
 0x3a7   : > { %s1764_s12 = smov %s1621_s29  ;;  %23 = sbr.rel (!%p21_p7) target bundleno = 5 (0x5), region = 112 }
 0x3ac   :  { %941 = vsyncpa [#allocation3], 1 }
 0x3ad   :  { %943 = vsyncpa [#allocation3 + $0x1], 1 }
 0x3ae   :  { %944 = vsyncpa [#allocation5], 1 }
 0x3af   :  { %945 = vsyncpa [#allocation8], 1 }

</bundles_post_ra>
